<compile_context>
chip_gen: v7x
topology: tpu7x:2x2x1
jax: 0.10.0
libtpu: 0.0.40
codegen_flags: <defaults>
</compile_context>

<pallas_src>
import jax
import jax.numpy as jnp
from jax.experimental import pallas as pl
from jax.experimental.pallas import tpu as pltpu

_LANES = 128
_SUBLANES = 8


def _loss_conf_kernel(x_ref, y_ref, loss_ref, match_ref):
    # x_ref / y_ref: (tile_rows, 128) lane-dense blocks of channel-0 logits / targets.
    x = x_ref[...]
    y = y_ref[...]
    if x.dtype != jnp.float32:
        x = x.astype(jnp.float32)
    if y.dtype != jnp.float32:
        y = y.astype(jnp.float32)

    # Numerically-stable BCE with logits (matches torch.nn.BCEWithLogitsLoss):
    #   l(x, y) = max(x, 0) - x*y + log(1 + exp(-|x|))
    bce = jnp.maximum(x, 0.0) - x * y + jnp.log(1.0 + jnp.exp(-jnp.abs(x)))

    r, c = bce.shape
    if r % _SUBLANES == 0:
        # Fold sublane groups with plain VPU adds; one (8,128) partial per tile.
        loss_ref[...] = bce.reshape(r // _SUBLANES, _SUBLANES, c).sum(axis=0)
    else:
        # Ragged tile: cross-sublane reduce (XLU, idle slot here) into row 0.
        colsum = jnp.sum(bce, axis=0, keepdims=True)
        rows = jax.lax.broadcasted_iota(jnp.int32, (_SUBLANES, c), 0)
        loss_ref[...] = jnp.where(
            rows == 0, jnp.broadcast_to(colsum, (_SUBLANES, c)), 0.0)

    # matches = (preds_conf > 0) == targets_conf  (torch promotes bool -> float and
    # compares with float equality).  Emitted as int8 {0,1}.
    match_ref[...] = ((x > 0.0).astype(jnp.float32) == y).astype(jnp.int8)


def _round_up(a, b):
    return ((a + b - 1) // b) * b


def _choose_tile_rows(rows_per_image, max_tile_rows):
    """Largest divisor of rows_per_image that is <= max_tile_rows and a multiple of 8
    (preferring multiples of 32 for the int8 output tiling).  None if impossible."""
    best8 = best32 = None
    lim = min(rows_per_image, max_tile_rows)
    d = _SUBLANES
    while d <= lim:
        if rows_per_image % d == 0:
            best8 = d
            if d % 32 == 0:
                best32 = d
        d += _SUBLANES
    return best32 if best32 is not None else best8


def _loss_confidence_fused(preds, targets, tile_rows):
    """Aligned fast path: channel-0 select fused into the index_map, zero padding."""
    B, C, H, W = preds.shape
    hw = H * W
    rows_per_image = hw // _LANES          # rows of channel-0 per batch element
    T = rows_per_image // tile_rows        # column-tile count per batch element
    ct = C * T                             # input blocks per batch element

    # Free, contiguous views of the full NCHW tensors.
    x2 = preds.reshape(B * C * rows_per_image, _LANES)
    y2 = targets.reshape(B * C * rows_per_image, _LANES)

    partials, match_i8 = pl.pallas_call(
        _loss_conf_kernel,
        out_shape=(
            jax.ShapeDtypeStruct((B * T * _SUBLANES, _LANES), jnp.float32),
            jax.ShapeDtypeStruct((B * rows_per_image, _LANES), jnp.int8),
        ),
        grid_spec=pltpu.PrefetchScalarGridSpec(
            num_scalar_prefetch=0,
            grid=(B, T),
            in_specs=[
                # Only the first rows_per_image rows of each batch (= channel 0) are
                # ever touched: the channel select is the index_map, not an XLA slice.
                pl.BlockSpec((tile_rows, _LANES), lambda b, t: (b * ct + t, 0)),
                pl.BlockSpec((tile_rows, _LANES), lambda b, t: (b * ct + t, 0)),
            ],
            out_specs=[
                pl.BlockSpec((_SUBLANES, _LANES), lambda b, t: (b * T + t, 0)),
                pl.BlockSpec((tile_rows, _LANES), lambda b, t: (b * T + t, 0)),
            ],
        ),
        compiler_params=pltpu.CompilerParams(
            dimension_semantics=("parallel", "parallel"),  # no carry -> megacore-friendly
            vmem_limit_bytes=32 * 1024 * 1024,
        ),
    )(x2, y2)

    loss = jnp.sum(partials)                                  # tiny final reduce in XLA
    matches = match_i8.reshape(B, H, W).astype(jnp.bool_)     # exact size, free reshape
    return loss, matches


def _loss_confidence_padded(preds, targets, max_tile_rows):
    """Fallback for shapes where H*W is not 128-aligned: slice channel 0 and pad.
    TODO(synk): could mask the ragged tail in-kernel instead of padding, but this path
    is only taken for unaligned spatial sizes."""
    B, C, H, W = preds.shape
    n = B * H * W
    x = preds[:, 0].reshape(-1)
    y = targets[:, 0].reshape(-1)

    rows = -(-n // _LANES)
    tile_rows = min(max_tile_rows, _round_up(rows, _SUBLANES))
    padded_rows = _round_up(rows, tile_rows)
    num_tiles = padded_rows // tile_rows
    pad = padded_rows * _LANES - n
    if pad:
        # Pad logits with a large negative value and targets with 0 so padded elements
        # contribute exactly 0 to the summed loss; their matches are sliced off below.
        x = jnp.concatenate([x, jnp.full((pad,), -1e4, dtype=x.dtype)])
        y = jnp.concatenate([y, jnp.zeros((pad,), dtype=y.dtype)])
    x2 = x.reshape(padded_rows, _LANES)
    y2 = y.reshape(padded_rows, _LANES)

    partials, match_i8 = pl.pallas_call(
        _loss_conf_kernel,
        out_shape=(
            jax.ShapeDtypeStruct((num_tiles * _SUBLANES, _LANES), jnp.float32),
            jax.ShapeDtypeStruct((padded_rows, _LANES), jnp.int8),
        ),
        grid_spec=pltpu.PrefetchScalarGridSpec(
            num_scalar_prefetch=0,
            grid=(num_tiles,),
            in_specs=[
                pl.BlockSpec((tile_rows, _LANES), lambda i: (i, 0)),
                pl.BlockSpec((tile_rows, _LANES), lambda i: (i, 0)),
            ],
            out_specs=[
                pl.BlockSpec((_SUBLANES, _LANES), lambda i: (i, 0)),
                pl.BlockSpec((tile_rows, _LANES), lambda i: (i, 0)),
            ],
        ),
        compiler_params=pltpu.CompilerParams(
            dimension_semantics=("parallel",),
            vmem_limit_bytes=32 * 1024 * 1024,
        ),
    )(x2, y2)

    loss = jnp.sum(partials)
    matches = (match_i8.reshape(-1)[:n] != 0).reshape(B, H, W)
    return loss, matches


def loss_confidence(preds, targets, *, max_tile_rows=4096):
    """preds, targets: [B, C, H, W] (NCHW). Returns (scalar loss, bool matches [B,H,W])."""
    B, C, H, W = preds.shape
    hw = H * W
    if hw % _LANES == 0:
        tile_rows = _choose_tile_rows(hw // _LANES, max_tile_rows)
        if tile_rows is not None:
            return _loss_confidence_fused(preds, targets, tile_rows)
    return _loss_confidence_padded(preds, targets, max_tile_rows)


def _reference(preds, targets):
    x = preds[:, 0].astype(jnp.float32)
    y = targets[:, 0].astype(jnp.float32)
    bce = jnp.maximum(x, 0.0) - x * y + jnp.log(1.0 + jnp.exp(-jnp.abs(x)))
    loss = jnp.sum(bce)
    matches = (jnp.where(x > 0.0, 1.0, 0.0) == y)
    return loss, matches


if __name__ == "__main__":
    key = jax.random.PRNGKey(0)
    fn = jax.jit(loss_confidence)

    # 1) Aligned fast path (H*W % 1024 == 0 -> fused channel select, no padding).
    k1, k2 = jax.random.split(key)
    B, C, H, W = 2, 4, 64, 64
    preds = jax.random.normal(k1, (B, C, H, W), dtype=jnp.float32) * 2.0
    targets = jax.random.bernoulli(k2, 0.5, (B, C, H, W)).astype(jnp.float32)

    loss, matches = fn(preds, targets)
    jax.block_until_ready((loss, matches))
    ref_loss, ref_matches = _reference(preds, targets)
    assert matches.shape == (B, H, W) and matches.dtype == jnp.bool_
    assert jnp.allclose(loss, ref_loss, rtol=1e-5, atol=1e-4), (loss, ref_loss)
    assert bool(jnp.all(matches == ref_matches))

    # 2) Small / unaligned spatial size exercises the padded fallback path.
    k3, k4 = jax.random.split(k2)
    B2, C2, H2, W2 = 2, 4, 16, 16
    preds2 = jax.random.normal(k3, (B2, C2, H2, W2), dtype=jnp.float32) * 2.0
    targets2 = jax.random.bernoulli(k4, 0.5, (B2, C2, H2, W2)).astype(jnp.float32)

    loss2, matches2 = fn(preds2, targets2)
    jax.block_until_ready((loss2, matches2))
    ref_loss2, ref_matches2 = _reference(preds2, targets2)
    assert matches2.shape == (B2, H2, W2)
    assert jnp.allclose(loss2, ref_loss2, rtol=1e-5, atol=1e-4), (loss2, ref_loss2)
    assert bool(jnp.all(matches2 == ref_matches2))

    print("KERNEL_OK")
</pallas_src>

<mosaic_0001>
module attributes {stable_mosaic.version = 11 : i64} {
  func.func @_loss_conf_kernel(%arg0: i32, %arg1: i32, %arg2: memref<32x128xf32, #tpu.memory_space<vmem>>, %arg3: memref<32x128xf32, #tpu.memory_space<vmem>>, %arg4: memref<8x128xf32, #tpu.memory_space<vmem>>, %arg5: memref<32x128xi8, #tpu.memory_space<vmem>>) attributes {dimension_semantics = [#tpu.dimension_semantics<parallel>, #tpu.dimension_semantics<parallel>], iteration_bounds = array<i64: 2, 1>, scalar_prefetch = 0 : i64, scratch_operands = 0 : i64, tpu.core_type = #tpu.core_type<tc>, window_params = [{transform_indices = @transform_0, window_bounds = array<i64: 32, 128>}, {transform_indices = @transform_1, window_bounds = array<i64: 32, 128>}, {transform_indices = @transform_2, window_bounds = array<i64: 8, 128>}, {transform_indices = @transform_3, window_bounds = array<i64: 32, 128>}]} {
    %c0 = arith.constant 0 : index
    %c0_0 = arith.constant 0 : index
    %0 = vector.load %arg2[%c0, %c0_0] : memref<32x128xf32, #tpu.memory_space<vmem>>, vector<32x128xf32>
    %c0_1 = arith.constant 0 : index
    %c0_2 = arith.constant 0 : index
    %1 = vector.load %arg3[%c0_1, %c0_2] : memref<32x128xf32, #tpu.memory_space<vmem>>, vector<32x128xf32>
    %cst = arith.constant 0.000000e+00 : f32
    %2 = vector.broadcast %cst : f32 to vector<32x128xf32>
    %3 = arith.maximumf %0, %2 : vector<32x128xf32>
    %4 = arith.mulf %0, %1 : vector<32x128xf32>
    %5 = arith.subf %3, %4 : vector<32x128xf32>
    %6 = math.absf %0 : vector<32x128xf32>
    %cst_3 = arith.constant 0.000000e+00 : f32
    %7 = vector.broadcast %cst_3 : f32 to vector<32x128xf32>
    %8 = arith.subf %7, %6 : vector<32x128xf32>
    %9 = math.exp %8 : vector<32x128xf32>
    %cst_4 = arith.constant 1.000000e+00 : f32
    %10 = vector.broadcast %cst_4 : f32 to vector<32x128xf32>
    %11 = arith.addf %10, %9 : vector<32x128xf32>
    %12 = math.log %11 : vector<32x128xf32>
    %13 = arith.addf %5, %12 : vector<32x128xf32>
    %14 = vector.shape_cast %13 : vector<32x128xf32> to vector<4x8x128xf32>
    %cst_5 = arith.constant dense<0.000000e+00> : vector<8x128xf32>
    %15 = vector.multi_reduction <add>, %14, %cst_5 [0] : vector<4x8x128xf32> to vector<8x128xf32>
    %c0_6 = arith.constant 0 : index
    %c0_7 = arith.constant 0 : index
    %16 = vector.load %arg4[%c0_6, %c0_7] : memref<8x128xf32, #tpu.memory_space<vmem>>, vector<8x128xf32>
    tpu.vector_store %arg4[%c0_6, %c0_7], %15 {strides = array<i32>} : memref<8x128xf32, #tpu.memory_space<vmem>>, vector<8x128xf32>,
    %cst_8 = arith.constant 0.000000e+00 : f32
    %17 = vector.broadcast %cst_8 : f32 to vector<32x128xf32>
    %18 = arith.cmpf ogt, %0, %17 : vector<32x128xf32>
    %19 = arith.extui %18 : vector<32x128xi1> to vector<32x128xi32>
    %20 = arith.sitofp %19 : vector<32x128xi32> to vector<32x128xf32>
    %21 = arith.cmpf oeq, %20, %1 : vector<32x128xf32>
    %22 = arith.extui %21 : vector<32x128xi1> to vector<32x128xi8>
    %c0_9 = arith.constant 0 : index
    %c0_10 = arith.constant 0 : index
    %23 = vector.load %arg5[%c0_9, %c0_10] : memref<32x128xi8, #tpu.memory_space<vmem>>, vector<32x128xi8>
    tpu.vector_store %arg5[%c0_9, %c0_10], %22 {strides = array<i32>} : memref<32x128xi8, #tpu.memory_space<vmem>>, vector<32x128xi8>,
    return
  }
  func.func @transform_0(%arg0: i32, %arg1: i32) -> (i32, i32) {
    %c4_i32 = arith.constant 4 : i32
    %0 = arith.muli %arg0, %c4_i32 : i32
    %1 = arith.addi %0, %arg1 : i32
    %c0_i32 = arith.constant 0 : i32
    %c0_i32_0 = arith.constant 0 : i32
    return %1, %c0_i32 : i32, i32
  }
  func.func @transform_1(%arg0: i32, %arg1: i32) -> (i32, i32) {
    %c4_i32 = arith.constant 4 : i32
    %0 = arith.muli %arg0, %c4_i32 : i32
    %1 = arith.addi %0, %arg1 : i32
    %c0_i32 = arith.constant 0 : i32
    %c0_i32_0 = arith.constant 0 : i32
    return %1, %c0_i32 : i32, i32
  }
  func.func @transform_2(%arg0: i32, %arg1: i32) -> (i32, i32) {
    %c1_i32 = arith.constant 1 : i32
    %0 = arith.muli %arg0, %c1_i32 : i32
    %1 = arith.addi %0, %arg1 : i32
    %c0_i32 = arith.constant 0 : i32
    %c0_i32_0 = arith.constant 0 : i32
    return %1, %c0_i32 : i32, i32
  }
  func.func @transform_3(%arg0: i32, %arg1: i32) -> (i32, i32) {
    %c1_i32 = arith.constant 1 : i32
    %0 = arith.muli %arg0, %c1_i32 : i32
    %1 = arith.addi %0, %arg1 : i32
    %c0_i32 = arith.constant 0 : i32
    %c0_i32_0 = arith.constant 0 : i32
    return %1, %c0_i32 : i32, i32
  }
}

</mosaic_0001>

<bundles_post_ra>
// kernel: loss_confidence.1
= control target key start
LH: loop header
LB: loop body
LE: loop exit
PB: predicated region body
PF: predicated region fallthrough
CT: control target
= control target key end

     0   :  { %s557_s12 = smov 0   ;;  %s559_s13 = smov 0   ;;  %s627_s0 = inlined_call_operand.vmem [shape: f32[256,128], index: 0, kind: input, shape index: {}]   ;;  %s628_s1 = inlined_call_operand.vmem [shape: f32[256,128], index: 1, kind: input, shape index: {}]   ;;  %s629_s2 = inlined_call_operand.vmem [shape: f32[16,128], index: 2, kind: output, shape index: {0}]   ;;  %s630_s3 = inlined_call_operand.vmem [shape: s8[64,128], index: 3, kind: output, shape index: {1}]  }
   0x1   :  { %s561_s14 = smov 0  }
   0x2 LB: > { %s26_s15 = sadd.s32 1, %s529_s13  ;;  %p452_p0 = scmp.ge.s32.totalorder %s533_s14, 1  ;;  %s533_s14 = sphi %s561_s14, %s14_s14   ;;  %s529_s13 = sphi %s559_s13, %s632_s13   ;;  %s525_s12 = sphi %s557_s12, %s631_s12  }
   0x3   : > { %p28_p1 = scmp.ge.s32.totalorder %s26_s15, 2  ;;  %p184_p2 = scmp.lt.s32.totalorder %s533_s14, 3 }
   0x5   : > { %s634_s15 = smov (%p28_p1, %s26_s15), 0  ;;  %p185_p3 = pnand %p452_p0, %p184_p2 }
   0x6   : > { %s467_s16 = sshll.u32 (!%p185_p3), %s525_s12, 4  ;;  %p243_p5 = scmp.lt.s32.totalorder (!%p185_p3), %s525_s12, 1  ;;  %v535_v17 = vmov (!%p185_p3), 0.0   ;;  %v536_v25 = vmov (!%p185_p3), 0  }
   0x7   : > { %188 = sbr.rel (%p185_p3) target bundleno = 60 (0x3c), region = 28  ;;  %p225_p4 = scmp.lt.s32.totalorder (!%p185_p3), %s467_s16, 31 }
   0xe   : > { %s636_s16 = smov (!%p225_p4, %s467_s16), 31  ;;  %s638_s12 = smov (!%p243_p5, %s525_s12), 1 }
   0xf   : > { %s455_s17 = sshll.u32 %s636_s16, 3  ;;  %s459_s24 = sshll.u32 %s638_s12, 3 }
  0x10   : > { %s228_s20 = scalar_lea.vmem %s627_s0, %s455_s17  ;;  %s238_s23 = scalar_lea.vmem %s628_s1, %s455_s17 }
  0x11   : > { %v578_v0 = vld [vmem:[%s228_s20] sm:$0xff]  ;;  %v580_v1 = vld [vmem:[%s228_s20 + $0x8] sm:$0xff]  ;;  %v582_v2 = vld [vmem:[%s228_s20 + $0x10] sm:$0xff]  ;;  %s252_s27 = scalar_lea.vmem %s630_s3, %s459_s24  ;;  %s246_s30 = scalar_lea.vmem %s629_s2, %s459_s24 }
  0x12   : > { %v584_v3 = vld [vmem:[%s228_s20 + $0x18] sm:$0xff]  ;;  %v276_v4 = vand.u32 2147483647, %v578_v0  ;;  %v277_v5 = vand.u32 2147483647, %v580_v1  ;;  %vm312_vm0 = vcmp.gt.f32.partialorder %v578_v0, 0.0 }
  0x13   : > { %v278_v6 = vand.u32 2147483647, %v582_v2  ;;  %v279_v7 = vand.u32 2147483647, %v584_v3  ;;  %vm313_vm1 = vcmp.gt.f32.partialorder %v580_v1, 0.0  ;;  %vm314_vm2 = vcmp.gt.f32.partialorder %v582_v2, 0.0 }
  0x14   : > { %v280_v8 = vsub.f32 0.0, %v276_v4  ;;  %v281_v9 = vsub.f32 0.0, %v277_v5  ;;  %vm315_vm3 = vcmp.gt.f32.partialorder %v584_v3, 0.0  ;;  %v260_v15 = vld [vmem:[%s238_s23] sm:$0xff]  ;;  %v461_v18 = vsel %vm312_vm0, 1.0, %v535_v17  ;;  %v261_v20 = vld [vmem:[%s238_s23 + $0x8] sm:$0xff] }
  0x15   : > { %v282_v10 = vsub.f32 0.0, %v278_v6  ;;  %v283_v11 = vsub.f32 0.0, %v279_v7  ;;  %v462_v19 = vsel %vm313_vm1, 1.0, %v535_v17  ;;  %v262_v21 = vld [vmem:[%s238_s23 + $0x10] sm:$0xff]  ;;  %v263_v22 = vld [vmem:[%s238_s23 + $0x18] sm:$0xff]  ;;  %v463_v23 = vsel %vm314_vm2, 1.0, %v535_v17 }
  0x16   : > { %v284_v12 = vmul.f32 1.442695, %v280_v8  ;;  %v286_v13 = vmul.f32 1.442695, %v281_v9  ;;  %v464_v24 = vsel %vm315_vm3, 1.0, %v535_v17  ;;  %vm324_vm4 = vcmp.eq.f32.partialorder %v461_v18, %v260_v15 }
  0x17   : > { %v288_v14 = vmul.f32 1.442695, %v282_v10  ;;  %v290_v16 = vmul.f32 1.442695, %v283_v11  ;;  %vm325_vm5 = vcmp.eq.f32.partialorder %v462_v19, %v261_v20  ;;  %vm326_vm6 = vcmp.eq.f32.partialorder %v463_v23, %v262_v21 }
  0x18   : > { %495 = vpow2.f32 %v284_v12  ;;  %vm327_vm7 = vcmp.eq.f32.partialorder %v464_v24, %v263_v22  ;;  %vm328_vm8 = vmpackc.low %vm325_vm5, %vm324_vm4  ;;  %v264_v35 = vmax.f32 %v578_v0, 0.0  ;;  %v268_v36 = vmul.f32 %v260_v15, %v578_v0 }
  0x19   : > { %497 = vpow2.f32 %v286_v13  ;;  %vm329_vm9 = vmpackc.low %vm327_vm7, %vm326_vm6  ;;  %v265_v37 = vmax.f32 %v580_v1, 0.0  ;;  %v269_v38 = vmul.f32 %v261_v20, %v580_v1  ;;  %v266_v39 = vmax.f32 %v582_v2, 0.0 }
  0x1a   : > { %499 = vpow2.f32 %v288_v14  ;;  %vm330_vm10 = vmpackc.even %vm329_vm9, %vm328_vm8  ;;  %v270_v40 = vmul.f32 %v262_v21, %v582_v2  ;;  %v267_v41 = vmax.f32 %v584_v3, 0.0  ;;  %v271_v42 = vmul.f32 %v263_v22, %v584_v3 }
  0x1b   : > { %501 = vpow2.f32 %v290_v16  ;;  %v331_v26 = vsel %vm330_vm10, 16843009, %v536_v25  ;;  %v272_v43 = vsub.f32 %v264_v35, %v268_v36  ;;  %v273_v45 = vsub.f32 %v265_v37, %v269_v38 }
  0x1c   : > { %332 = vst [vmem:[%s252_s27] sm:$0xff] %v331_v26  ;;  %v274_v47 = vsub.f32 %v266_v39, %v270_v40  ;;  %v275_v50 = vsub.f32 %v267_v41, %v271_v42 }
  0x22   : > { %v496_v27 = vpop.eup %495 }
  0x23   : > { %v498_v28 = vpop.eup %497  ;;  %v292_v29 = vadd.f32 1.0, %v496_v27 }
  0x24   : > { %v500_v30 = vpop.eup %499  ;;  %v293_v31 = vadd.f32 1.0, %v498_v28 }
  0x25   : > { %v502_v32 = vpop.eup %501  ;;  %v294_v33 = vadd.f32 1.0, %v500_v30  ;;  %503 = vlog2.f32 %v292_v29 }
  0x26   : > { %v295_v34 = vadd.f32 1.0, %v502_v32  ;;  %505 = vlog2.f32 %v293_v31 }
  0x27   : > { %507 = vlog2.f32 %v294_v33 }
  0x28   : > { %509 = vlog2.f32 %v295_v34 }
  0x2f   : > { %v504_v44 = vpop.eup %503 }
  0x30   : > { %v506_v46 = vpop.eup %505  ;;  %v297_v48 = vmul.f32 0.6931472, %v504_v44 }
  0x31   : > { %v508_v49 = vpop.eup %507  ;;  %v299_v51 = vmul.f32 0.6931472, %v506_v46 }
  0x32   : > { %v510_v52 = vpop.eup %509  ;;  %v301_v53 = vmul.f32 0.6931472, %v508_v49  ;;  %v304_v54 = vadd.f32 %v297_v48, %v272_v43 }
  0x33   : > { %v303_v55 = vmul.f32 0.6931472, %v510_v52  ;;  %v305_v56 = vadd.f32 %v299_v51, %v273_v45 }
  0x34   : > { %v306_v57 = vadd.f32 %v301_v53, %v274_v47 }
  0x35   : > { %v307_v58 = vadd.f32 %v303_v55, %v275_v50  ;;  %v308_v59 = vadd.f32 %v305_v56, %v304_v54 }
  0x37   : > { %v309_v60 = vadd.f32 %v308_v59, %v306_v57 }
  0x39   : > { %v310_v61 = vadd.f32 %v309_v60, %v307_v58 }
  0x3b   : > { %311 = vst [vmem:[%s246_s30] sm:$0xff] %v310_v61 }
  0x3c PF: > { %s14_s14 = sadd.s32 1, %s533_s14   ;;  %s631_s12 = smov %s529_s13 }
  0x3d   : > { %p11_p6 = scmp.ge.s32.totalorder %s14_s14, 4   ;;  %s632_s13 = smov %s634_s15 }
  0x3f   :  { %13 = sbr.rel (!%p11_p6) target bundleno = 2 (0x2), region = 73 }

</bundles_post_ra>
